<compile_context>
chip_gen: v7x
topology: tpu7x:2x2x1
jax: 0.10.0
libtpu: 0.0.40
codegen_flags: <defaults>
</compile_context>

<pallas_src>
import functools
import math
import numbers
import numpy as np
from collections.abc import Sequence

import jax
import jax.numpy as jnp
from jax.experimental import pallas as pl
from jax.experimental.pallas import tpu as pltpu


# ----------------------------------------------------------------------------
# Host-side: crop-box sampling (mirrors torchvision get_params semantics)
# ----------------------------------------------------------------------------
def get_params(height, width, scale, ratio, rng):
    area = height * width
    log_ratio = (math.log(ratio[0]), math.log(ratio[1]))
    for _ in range(10):
        target_area = area * rng.uniform(scale[0], scale[1])
        aspect_ratio = math.exp(rng.uniform(log_ratio[0], log_ratio[1]))
        w = int(round(math.sqrt(target_area * aspect_ratio)))
        h = int(round(math.sqrt(target_area / aspect_ratio)))
        if 0 < w <= width and 0 < h <= height:
            i = int(rng.integers(0, height - h + 1))
            j = int(rng.integers(0, width - w + 1))
            return (i, j, h, w)
    in_ratio = float(width) / float(height)
    if in_ratio < min(ratio):
        w = width
        h = int(round(w / min(ratio)))
    elif in_ratio > max(ratio):
        h = height
        w = int(round(h * max(ratio)))
    else:
        w = width
        h = height
    i = (height - h) // 2
    j = (width - w) // 2
    return (i, j, h, w)


# ----------------------------------------------------------------------------
# Host-side: vectorized separable bilinear matrix (torch bilinear,
# align_corners=False).  Defined over a window of `num_cols` source samples;
# the crop starts at column `col_offset`.  Columns outside the crop are zero.
# ----------------------------------------------------------------------------
def bilinear_matrix(crop_len, out_len, col_offset, num_cols):
    scale = crop_len / out_len
    d = np.arange(out_len, dtype=np.float64)
    src = np.maximum((d + 0.5) * scale - 0.5, 0.0)   # PyTorch clamps negatives
    f = np.floor(src)
    lam = src - f
    i0 = np.minimum(f.astype(np.int64), crop_len - 1)
    i1 = np.minimum(i0 + 1, crop_len - 1)
    rows = np.arange(out_len)
    M = np.zeros((out_len, num_cols), dtype=np.float64)
    M[rows, col_offset + i0] += (1.0 - lam)
    M[rows, col_offset + i1] += lam                  # i0 == i1 -> weight 1.0
    return M.astype(np.float32)


# ----------------------------------------------------------------------------
# Tile selection.  Small tiles bound per-step VMEM and alignment padding;
# the W tile is dtype-aware so each DMA'd row is >= ~512 bytes (v5e DMA).
# ----------------------------------------------------------------------------
def _round_up(x, m):
    return ((x + m - 1) // m) * m


def _pick_tile_h(H, h):
    # multiple of 32 (sublane packing for any dtype), sized to the crop
    cand = min(128, max(32, _round_up(min(h, 128), 32)))
    return H if cand >= H else cand


def _pick_tile_w(W, w, itemsize):
    # multiple of 128 lanes; >= ~512 B per DMA'd row (u8: 512, bf16: 256, f32: 128)
    min_elems = max(128, 512 // itemsize)
    cand = min(1024, max(min_elems, _round_up(min(max(w, 1), 1024), 128)))
    return W if cand >= W else cand


# ----------------------------------------------------------------------------
# Pallas kernel builder (cached per static signature).
# Grid: (N, K_outer, K_inner).  The crop window is covered by KH x KW tiles of
# (th, tw); the starting tile indices arrive via scalar prefetch (box).
# W-first order: inner axis = W tiles (accumulate tmp (C, th, OW)), outer = H
#                tiles (accumulate acc (C, OH, OW)).
# H-first order: symmetric (inner = H tiles, tmp (C, OH, tw)).
# ----------------------------------------------------------------------------
@functools.lru_cache(maxsize=None)
def _build_resized_crop(N, C, H, W, th, tw, KH, KW, OH, OW,
                        in_dtype_str, w_first, mask_h, mask_w):
    in_dt = jnp.dtype(in_dtype_str)
    isz = in_dt.itemsize
    is_int = jnp.issubdtype(in_dt, jnp.integer)
    flatten = (th % 8) == 0      # safe (C, th, tw) -> (C*th, tw) merge in f32

    def _finalize(acc):          # acc: (C, OH, OW) f32
        if is_int:
            info = jnp.iinfo(in_dt)
            acc = jnp.clip(jnp.round(acc), float(info.min), float(info.max))
            # TODO(synk): torch's float->int conversion in interpolate may
            # round differently at exact .5 ties; we round-half-even + clip.
            return acc.astype(jnp.int32).astype(in_dt)
        return acc.astype(in_dt)

    def _load_tile(img_ref, box_ref, kh, kw):
        # Per-tile cast to f32 (tiles are small, so the cast copy is tiny).
        x = img_ref[0]
        if is_int:
            x = x.astype(jnp.int32)
        x = x.astype(jnp.float32)                               # (C, th, tw)
        if mask_h or mask_w:
            # Zero rows/cols that fall past the image edge in a partial tile,
            # so zero-weight columns never touch uninitialized padding.
            ok = None
            if mask_h:
                valid_h = H - (box_ref[0] + kh) * th
                ri = jax.lax.broadcasted_iota(jnp.int32, (th, tw), 0)
                ok = ri < valid_h
            if mask_w:
                valid_w = W - (box_ref[1] + kw) * tw
                ci = jax.lax.broadcasted_iota(jnp.int32, (th, tw), 1)
                okw = ci < valid_w
                ok = okw if ok is None else jnp.logical_and(ok, okw)
            x = jnp.where(ok[None, :, :], x, 0.0)
        return x

    if w_first:
        def kernel(box_ref, img_ref, rh_ref, rwT_ref, out_ref, tmp_ref, acc_ref):
            kh = pl.program_id(1)
            kw = pl.program_id(2)

            @pl.when(kw == 0)
            def _():
                tmp_ref[...] = jnp.zeros_like(tmp_ref)

            @pl.when(jnp.logical_and(kh == 0, kw == 0))
            def _():
                acc_ref[...] = jnp.zeros_like(acc_ref)

            x = _load_tile(img_ref, box_ref, kh, kw)      # (C, th, tw) f32
            rwT_blk = rwT_ref[0]                          # (tw, OW)    f32
            if flatten:
                # One MXU matmul with M = C*th (fills the array better).
                t = jnp.dot(x.reshape(C * th, tw), rwT_blk,
                            preferred_element_type=jnp.float32)
                tmp_ref[...] += t.reshape(C, th, OW)
            else:
                for c in range(C):
                    tmp_ref[c] += jnp.dot(x[c], rwT_blk,
                                          preferred_element_type=jnp.float32)

            @pl.when(kw == pl.num_programs(2) - 1)
            def _():
                rh_blk = rh_ref[0]                        # (OH, th) f32
                # TODO(synk): for very small OH*OW, fold C into the N dim of
                # this matmul to amortize MXU fill/drain (review item 9).
                for c in range(C):
                    acc_ref[c] += jnp.dot(rh_blk, tmp_ref[c],
                                          preferred_element_type=jnp.float32)

                @pl.when(kh == pl.num_programs(1) - 1)
                def _():
                    out_ref[0] = _finalize(acc_ref[...])

        grid = (N, KH, KW)
        img_spec = pl.BlockSpec(
            (1, C, th, tw), lambda n, a, b, box: (n, 0, box[0] + a, box[1] + b))
        rh_spec = pl.BlockSpec((1, OH, th), lambda n, a, b, box: (a, 0, 0))
        rwt_spec = pl.BlockSpec((1, tw, OW), lambda n, a, b, box: (b, 0, 0))
        tmp_shape = (C, th, OW)
    else:
        def kernel(box_ref, img_ref, rh_ref, rwT_ref, out_ref, tmp_ref, acc_ref):
            kw = pl.program_id(1)
            kh = pl.program_id(2)

            @pl.when(kh == 0)
            def _():
                tmp_ref[...] = jnp.zeros_like(tmp_ref)

            @pl.when(jnp.logical_and(kh == 0, kw == 0))
            def _():
                acc_ref[...] = jnp.zeros_like(acc_ref)

            x = _load_tile(img_ref, box_ref, kh, kw)      # (C, th, tw) f32
            rh_blk = rh_ref[0]                            # (OH, th)
            for c in range(C):
                tmp_ref[c] += jnp.dot(rh_blk, x[c],
                                      preferred_element_type=jnp.float32)

            @pl.when(kh == pl.num_programs(2) - 1)
            def _():
                rwT_blk = rwT_ref[0]                      # (tw, OW)
                for c in range(C):
                    acc_ref[c] += jnp.dot(tmp_ref[c], rwT_blk,
                                          preferred_element_type=jnp.float32)

                @pl.when(kw == pl.num_programs(1) - 1)
                def _():
                    out_ref[0] = _finalize(acc_ref[...])

        grid = (N, KW, KH)
        img_spec = pl.BlockSpec(
            (1, C, th, tw), lambda n, a, b, box: (n, 0, box[0] + b, box[1] + a))
        rh_spec = pl.BlockSpec((1, OH, th), lambda n, a, b, box: (b, 0, 0))
        rwt_spec = pl.BlockSpec((1, tw, OW), lambda n, a, b, box: (a, 0, 0))
        tmp_shape = (C, OH, tw)

    # --- explicit VMEM budget from the actual per-step footprint (item 1) ----
    img_blk = C * th * tw * isz
    wt_blk = (OH * th + tw * OW) * 4
    out_blk = C * OH * OW * isz
    scratch = (int(np.prod(tmp_shape)) + C * OH * OW) * 4
    cast_tmp = C * th * tw * 4                       # in-kernel f32 tile copy
    footprint = 2 * (img_blk + wt_blk + out_blk) + scratch + cast_tmp
    vmem_limit = int(min(64 << 20, max((3 * footprint) // 2 + (8 << 20),
                                       24 << 20)))

    # --- advisory cost estimate (item 8) --------------------------------------
    Hw, Ww = KH * th, KW * tw
    if w_first:
        flops = 2 * N * C * (Hw * Ww * OW + Hw * OH * OW)
    else:
        flops = 2 * N * C * (OH * Hw * Ww + OH * Ww * OW)
    bytes_accessed = (N * (C * Hw * Ww * isz + C * OH * OW * isz)
                      + (KH * OH * th + KW * tw * OW) * 4)
    cost = pl.CostEstimate(flops=int(flops), transcendentals=0,
                           bytes_accessed=int(bytes_accessed))

    call = pl.pallas_call(
        kernel,
        out_shape=jax.ShapeDtypeStruct((N, C, OH, OW), in_dt),
        grid_spec=pltpu.PrefetchScalarGridSpec(
            num_scalar_prefetch=1,
            grid=grid,
            in_specs=[img_spec, rh_spec, rwt_spec],
            out_specs=pl.BlockSpec((1, C, OH, OW),
                                   lambda n, a, b, box: (n, 0, 0, 0)),
            scratch_shapes=[pltpu.VMEM(tmp_shape, jnp.float32),
                            pltpu.VMEM((C, OH, OW), jnp.float32)],
        ),
        compiler_params=pltpu.CompilerParams(
            dimension_semantics=("parallel", "arbitrary", "arbitrary"),
            vmem_limit_bytes=vmem_limit,
        ),
        cost_estimate=cost,
    )
    # NOTE: small per-step blocks would also admit pipeline_mode=pl.Buffered(3)
    # on the image spec to hide DMA latency further (review item 8).
    return jax.jit(call)


# ----------------------------------------------------------------------------
# Functional entry point: bilinear resized-crop of NCHW `img`.
# ----------------------------------------------------------------------------
def resized_crop(img, i, j, h, w, size):
    N, C, H, W = img.shape
    OH, OW = int(size[0]), int(size[1])
    i, j, h, w = int(i), int(j), int(h), int(w)
    assert 0 <= i and 0 <= j and h >= 1 and w >= 1 and i + h <= H and j + w <= W

    in_dt = jnp.dtype(img.dtype)
    th = _pick_tile_h(H, h)
    tw = _pick_tile_w(W, w, in_dt.itemsize)
    bh, bw = i // th, j // tw
    KH = (i + h - 1) // th - bh + 1
    KW = (j + w - 1) // tw - bw + 1
    mask_h = (H % th) != 0            # last H tile of the image is partial
    mask_w = (W % tw) != 0

    # Contraction-order selection (review item 4): pick the cheaper order.
    Hw, Ww = KH * th, KW * tw
    w_first = Hw * OW * (Ww + OH) <= OH * Ww * (Hw + OW)

    # f32 separable weights over the tiled window, stacked per tile so every
    # BlockSpec block has full last-two dims (item 10: no bf16 double-rounding).
    rh = bilinear_matrix(h, OH, i - bh * th, Hw)                     # (OH, Hw)
    rh = np.ascontiguousarray(rh.reshape(OH, KH, th).transpose(1, 0, 2))
    rwT = bilinear_matrix(w, OW, j - bw * tw, Ww).T                  # (Ww, OW)
    rwT = np.ascontiguousarray(rwT.reshape(KW, tw, OW))

    fn = _build_resized_crop(N, C, H, W, th, tw, KH, KW, OH, OW,
                             str(in_dt), bool(w_first), bool(mask_h),
                             bool(mask_w))
    box = jnp.array([bh, bw], dtype=jnp.int32)      # starting tile indices
    return fn(box, img, jnp.asarray(rh), jnp.asarray(rwT))


# ----------------------------------------------------------------------------
# Module-equivalent wrapper
# ----------------------------------------------------------------------------
def _setup_size(size):
    if isinstance(size, numbers.Number):
        return (int(size), int(size))
    if isinstance(size, Sequence) and len(size) == 1:
        return (int(size[0]), int(size[0]))
    if len(size) != 2:
        raise ValueError("Please provide only two dimensions (h, w) for size.")
    return (int(size[0]), int(size[1]))


class RandomResizedCropBox:
    def __init__(self, size, scale=(0.08, 1.0), ratio=(3.0 / 4.0, 4.0 / 3.0),
                 interpolation="bilinear", seed=0):
        self.size = _setup_size(size)
        if not isinstance(scale, Sequence) or not isinstance(ratio, Sequence):
            raise TypeError("Scale and ratio should be sequences")
        self.scale = scale
        self.ratio = ratio
        self.interpolation = interpolation
        self._rng = np.random.default_rng(seed)     # deterministic sampler

    def __call__(self, img):
        N, C, H, W = img.shape
        i, j, h, w = get_params(H, W, self.scale, self.ratio, self._rng)
        out = resized_crop(img, i, j, h, w, self.size)
        return out, (i, j, h, w)


# ----------------------------------------------------------------------------
# Pure-JAX reference (full-plane f32 matrices, same math)
# ----------------------------------------------------------------------------
def _ref_resized_crop_f32(img, i, j, h, w, out_h, out_w):
    H, W = img.shape[-2], img.shape[-1]
    rh = jnp.asarray(bilinear_matrix(h, out_h, i, H), jnp.float32)
    rwT = jnp.asarray(bilinear_matrix(w, out_w, j, W).T, jnp.float32)
    return jnp.einsum("oy,ncyx,xw->ncow", rh, img.astype(jnp.float32), rwT)


if __name__ == "__main__":
    key = jax.random.PRNGKey(0)

    # 1) Module path at the required small shapes (single tile, W-first).
    N, C, H, W = 2, 4, 16, 16
    img = jax.random.normal(key, (N, C, H, W), dtype=jnp.float32)
    module = RandomResizedCropBox(size=(8, 8), seed=0)
    out, (i, j, h, w) = module(img)
    out = jax.block_until_ready(out)
    ref = _ref_resized_crop_f32(img, i, j, h, w, 8, 8)
    assert out.shape == (N, C, 8, 8) and out.dtype == img.dtype
    assert jnp.allclose(out.astype(jnp.float32), ref, atol=1e-4, rtol=1e-4)

    # 2) Forced crop with non-zero offsets: multi-tile window (KH=KW=2) with
    #    partial-edge masking; H-first contraction order is selected.
    img2 = jax.random.normal(jax.random.fold_in(key, 1), (2, 3, 48, 160),
                             dtype=jnp.float32)
    out2 = jax.block_until_ready(resized_crop(img2, 25, 60, 20, 90, (8, 16)))
    ref2 = _ref_resized_crop_f32(img2, 25, 60, 20, 90, 8, 16)
    assert jnp.allclose(out2.astype(jnp.float32), ref2, atol=1e-4, rtol=1e-4)

    # 3) Same crop, tall output -> W-first order path, multi-tile + masking.
    out3 = jax.block_until_ready(resized_crop(img2, 25, 60, 20, 90, (32, 8)))
    ref3 = _ref_resized_crop_f32(img2, 25, 60, 20, 90, 32, 8)
    assert jnp.allclose(out3.astype(jnp.float32), ref3, atol=1e-4, rtol=1e-4)

    # 4) uint8 input: exercises the integer round/clip store path.
    img4 = jax.random.randint(jax.random.fold_in(key, 2), (2, 3, 32, 32),
                              0, 256, dtype=jnp.int32).astype(jnp.uint8)
    out4 = jax.block_until_ready(resized_crop(img4, 4, 7, 20, 18, (8, 8)))
    ref4 = jnp.clip(jnp.round(_ref_resized_crop_f32(img4, 4, 7, 20, 18, 8, 8)),
                    0, 255)
    assert out4.dtype == jnp.uint8
    assert jnp.max(jnp.abs(out4.astype(jnp.int32) - ref4.astype(jnp.int32))) <= 1

    print("KERNEL_OK")
</pallas_src>

<mosaic_0001>
module attributes {stable_mosaic.version = 11 : i64} {
  func.func @kernel(%arg0: i32, %arg1: i32, %arg2: i32, %arg3: memref<2xi32, #tpu.memory_space<smem>>, %arg4: memref<1x4x16x16xf32, #tpu.memory_space<vmem>>, %arg5: memref<1x8x16xf32, #tpu.memory_space<vmem>>, %arg6: memref<1x16x8xf32, #tpu.memory_space<vmem>>, %arg7: memref<1x4x8x8xf32, #tpu.memory_space<vmem>>, %arg8: memref<4x16x8xf32, #tpu.memory_space<vmem>>, %arg9: memref<4x8x8xf32, #tpu.memory_space<vmem>>) attributes {dimension_semantics = [#tpu.dimension_semantics<parallel>, #tpu.dimension_semantics<arbitrary>, #tpu.dimension_semantics<arbitrary>], iteration_bounds = array<i64: 2, 1, 1>, scalar_prefetch = 1 : i64, scratch_operands = 2 : i64, tpu.core_type = #tpu.core_type<tc>, window_params = [{transform_indices = @transform_0, window_bounds = array<i64: 1, 4, 16, 16>}, {transform_indices = @transform_1, window_bounds = array<i64: 1, 8, 16>}, {transform_indices = @transform_2, window_bounds = array<i64: 1, 16, 8>}, {transform_indices = @transform_3, window_bounds = array<i64: 1, 4, 8, 8>}]} {
    %c0_i32 = arith.constant 0 : i32
    %0 = arith.cmpi eq, %arg2, %c0_i32 : i32
    %1 = arith.extui %0 : i1 to i32
    %c0_i32_0 = arith.constant 0 : i32
    %2 = arith.cmpi ne, %1, %c0_i32_0 : i32
    scf.if %2 {
      %cst_18 = arith.constant 0.000000e+00 : f32
      %21 = vector.broadcast %cst_18 : f32 to vector<4x16x8xf32>
      %c0_19 = arith.constant 0 : index
      %c0_20 = arith.constant 0 : index
      %c0_21 = arith.constant 0 : index
      %22 = vector.load %arg8[%c0_19, %c0_20, %c0_21] : memref<4x16x8xf32, #tpu.memory_space<vmem>>, vector<4x16x8xf32>
      tpu.vector_store %arg8[%c0_19, %c0_20, %c0_21], %21 {strides = array<i32>} : memref<4x16x8xf32, #tpu.memory_space<vmem>>, vector<4x16x8xf32>,
    } else {
    }
    %c0_i32_1 = arith.constant 0 : i32
    %3 = arith.cmpi eq, %arg1, %c0_i32_1 : i32
    %c0_i32_2 = arith.constant 0 : i32
    %4 = arith.cmpi eq, %arg2, %c0_i32_2 : i32
    %5 = arith.andi %3, %4 : i1
    %6 = arith.extui %5 : i1 to i32
    %c0_i32_3 = arith.constant 0 : i32
    %7 = arith.cmpi ne, %6, %c0_i32_3 : i32
    scf.if %7 {
      %cst_18 = arith.constant 0.000000e+00 : f32
      %21 = vector.broadcast %cst_18 : f32 to vector<4x8x8xf32>
      %c0_19 = arith.constant 0 : index
      %c0_20 = arith.constant 0 : index
      %c0_21 = arith.constant 0 : index
      %22 = vector.load %arg9[%c0_19, %c0_20, %c0_21] : memref<4x8x8xf32, #tpu.memory_space<vmem>>, vector<4x8x8xf32>
      tpu.vector_store %arg9[%c0_19, %c0_20, %c0_21], %21 {strides = array<i32>} : memref<4x8x8xf32, #tpu.memory_space<vmem>>, vector<4x8x8xf32>,
    } else {
    }
    %c0 = arith.constant 0 : index
    %c0_4 = arith.constant 0 : index
    %c0_5 = arith.constant 0 : index
    %c0_6 = arith.constant 0 : index
    %8 = vector.load %arg4[%c0, %c0_4, %c0_5, %c0_6] : memref<1x4x16x16xf32, #tpu.memory_space<vmem>>, vector<1x4x16x16xf32>
    %9 = vector.shape_cast %8 : vector<1x4x16x16xf32> to vector<4x16x16xf32>
    %c0_7 = arith.constant 0 : index
    %c0_8 = arith.constant 0 : index
    %c0_9 = arith.constant 0 : index
    %10 = vector.load %arg6[%c0_7, %c0_8, %c0_9] : memref<1x16x8xf32, #tpu.memory_space<vmem>>, vector<1x16x8xf32>
    %11 = vector.shape_cast %10 : vector<1x16x8xf32> to vector<16x8xf32>
    %12 = vector.shape_cast %9 : vector<4x16x16xf32> to vector<64x16xf32>
    %cst = arith.constant dense<0.000000e+00> : vector<64x8xf32>
    %13 = tpu.matmul %12, %11, %cst {dimension_numbers = #tpu.dot_dimension_numbers<[1], [0], [0], [1], [0, 0, 1, 1], [], []>} : vector<64x16xf32>, vector<16x8xf32>, vector<64x8xf32> -> vector<64x8xf32>
    %c0_10 = arith.constant 0 : index
    %c0_11 = arith.constant 0 : index
    %c0_12 = arith.constant 0 : index
    %14 = vector.load %arg8[%c0_10, %c0_11, %c0_12] : memref<4x16x8xf32, #tpu.memory_space<vmem>>, vector<4x16x8xf32>
    %15 = vector.shape_cast %13 : vector<64x8xf32> to vector<4x16x8xf32>
    %16 = arith.addf %14, %15 : vector<4x16x8xf32>
    %c0_13 = arith.constant 0 : index
    %c0_14 = arith.constant 0 : index
    %c0_15 = arith.constant 0 : index
    %17 = vector.load %arg8[%c0_13, %c0_14, %c0_15] : memref<4x16x8xf32, #tpu.memory_space<vmem>>, vector<4x16x8xf32>
    tpu.vector_store %arg8[%c0_13, %c0_14, %c0_15], %16 {strides = array<i32>} : memref<4x16x8xf32, #tpu.memory_space<vmem>>, vector<4x16x8xf32>,
    %c0_i32_16 = arith.constant 0 : i32
    %18 = arith.cmpi eq, %arg2, %c0_i32_16 : i32
    %19 = arith.extui %18 : i1 to i32
    %c0_i32_17 = arith.constant 0 : i32
    %20 = arith.cmpi ne, %19, %c0_i32_17 : i32
    scf.if %20 {
      %c0_18 = arith.constant 0 : index
      %c0_19 = arith.constant 0 : index
      %c0_20 = arith.constant 0 : index
      %21 = vector.load %arg5[%c0_18, %c0_19, %c0_20] : memref<1x8x16xf32, #tpu.memory_space<vmem>>, vector<1x8x16xf32>
      %22 = vector.shape_cast %21 : vector<1x8x16xf32> to vector<8x16xf32>
      %c0_21 = arith.constant 0 : index
      %c0_22 = arith.constant 0 : index
      %c0_23 = arith.constant 0 : index
      %23 = vector.load %arg9[%c0_21, %c0_22, %c0_23] : memref<4x8x8xf32, #tpu.memory_space<vmem>>, vector<1x8x8xf32>
      %24 = vector.shape_cast %23 : vector<1x8x8xf32> to vector<8x8xf32>
      %c0_24 = arith.constant 0 : index
      %c0_25 = arith.constant 0 : index
      %c0_26 = arith.constant 0 : index
      %25 = vector.load %arg8[%c0_24, %c0_25, %c0_26] : memref<4x16x8xf32, #tpu.memory_space<vmem>>, vector<1x16x8xf32>
      %26 = vector.shape_cast %25 : vector<1x16x8xf32> to vector<16x8xf32>
      %cst_27 = arith.constant dense<0.000000e+00> : vector<8x8xf32>
      %27 = tpu.matmul %22, %26, %cst_27 {dimension_numbers = #tpu.dot_dimension_numbers<[1], [0], [0], [1], [0, 0, 1, 1], [], []>} : vector<8x16xf32>, vector<16x8xf32>, vector<8x8xf32> -> vector<8x8xf32>
      %28 = arith.addf %24, %27 : vector<8x8xf32>
      %c0_28 = arith.constant 0 : index
      %c0_29 = arith.constant 0 : index
      %c0_30 = arith.constant 0 : index
      %29 = vector.load %arg9[%c0_28, %c0_29, %c0_30] : memref<4x8x8xf32, #tpu.memory_space<vmem>>, vector<1x8x8xf32>
      %30 = vector.shape_cast %29 : vector<1x8x8xf32> to vector<8x8xf32>
      %31 = vector.shape_cast %28 : vector<8x8xf32> to vector<1x8x8xf32>
      tpu.vector_store %arg9[%c0_28, %c0_29, %c0_30], %31 {strides = array<i32>} : memref<4x8x8xf32, #tpu.memory_space<vmem>>, vector<1x8x8xf32>,
      %c1 = arith.constant 1 : index
      %c0_31 = arith.constant 0 : index
      %c0_32 = arith.constant 0 : index
      %32 = vector.load %arg9[%c1, %c0_31, %c0_32] : memref<4x8x8xf32, #tpu.memory_space<vmem>>, vector<1x8x8xf32>
      %33 = vector.shape_cast %32 : vector<1x8x8xf32> to vector<8x8xf32>
      %c1_33 = arith.constant 1 : index
      %c0_34 = arith.constant 0 : index
      %c0_35 = arith.constant 0 : index
      %34 = vector.load %arg8[%c1_33, %c0_34, %c0_35] : memref<4x16x8xf32, #tpu.memory_space<vmem>>, vector<1x16x8xf32>
      %35 = vector.shape_cast %34 : vector<1x16x8xf32> to vector<16x8xf32>
      %cst_36 = arith.constant dense<0.000000e+00> : vector<8x8xf32>
      %36 = tpu.matmul %22, %35, %cst_36 {dimension_numbers = #tpu.dot_dimension_numbers<[1], [0], [0], [1], [0, 0, 1, 1], [], []>} : vector<8x16xf32>, vector<16x8xf32>, vector<8x8xf32> -> vector<8x8xf32>
      %37 = arith.addf %33, %36 : vector<8x8xf32>
      %c1_37 = arith.constant 1 : index
      %c0_38 = arith.constant 0 : index
      %c0_39 = arith.constant 0 : index
      %38 = vector.load %arg9[%c1_37, %c0_38, %c0_39] : memref<4x8x8xf32, #tpu.memory_space<vmem>>, vector<1x8x8xf32>
      %39 = vector.shape_cast %38 : vector<1x8x8xf32> to vector<8x8xf32>
      %40 = vector.shape_cast %37 : vector<8x8xf32> to vector<1x8x8xf32>
      tpu.vector_store %arg9[%c1_37, %c0_38, %c0_39], %40 {strides = array<i32>} : memref<4x8x8xf32, #tpu.memory_space<vmem>>, vector<1x8x8xf32>,
      %c2 = arith.constant 2 : index
      %c0_40 = arith.constant 0 : index
      %c0_41 = arith.constant 0 : index
      %41 = vector.load %arg9[%c2, %c0_40, %c0_41] : memref<4x8x8xf32, #tpu.memory_space<vmem>>, vector<1x8x8xf32>
      %42 = vector.shape_cast %41 : vector<1x8x8xf32> to vector<8x8xf32>
      %c2_42 = arith.constant 2 : index
      %c0_43 = arith.constant 0 : index
      %c0_44 = arith.constant 0 : index
      %43 = vector.load %arg8[%c2_42, %c0_43, %c0_44] : memref<4x16x8xf32, #tpu.memory_space<vmem>>, vector<1x16x8xf32>
      %44 = vector.shape_cast %43 : vector<1x16x8xf32> to vector<16x8xf32>
      %cst_45 = arith.constant dense<0.000000e+00> : vector<8x8xf32>
      %45 = tpu.matmul %22, %44, %cst_45 {dimension_numbers = #tpu.dot_dimension_numbers<[1], [0], [0], [1], [0, 0, 1, 1], [], []>} : vector<8x16xf32>, vector<16x8xf32>, vector<8x8xf32> -> vector<8x8xf32>
      %46 = arith.addf %42, %45 : vector<8x8xf32>
      %c2_46 = arith.constant 2 : index
      %c0_47 = arith.constant 0 : index
      %c0_48 = arith.constant 0 : index
      %47 = vector.load %arg9[%c2_46, %c0_47, %c0_48] : memref<4x8x8xf32, #tpu.memory_space<vmem>>, vector<1x8x8xf32>
      %48 = vector.shape_cast %47 : vector<1x8x8xf32> to vector<8x8xf32>
      %49 = vector.shape_cast %46 : vector<8x8xf32> to vector<1x8x8xf32>
      tpu.vector_store %arg9[%c2_46, %c0_47, %c0_48], %49 {strides = array<i32>} : memref<4x8x8xf32, #tpu.memory_space<vmem>>, vector<1x8x8xf32>,
      %c3 = arith.constant 3 : index
      %c0_49 = arith.constant 0 : index
      %c0_50 = arith.constant 0 : index
      %50 = vector.load %arg9[%c3, %c0_49, %c0_50] : memref<4x8x8xf32, #tpu.memory_space<vmem>>, vector<1x8x8xf32>
      %51 = vector.shape_cast %50 : vector<1x8x8xf32> to vector<8x8xf32>
      %c3_51 = arith.constant 3 : index
      %c0_52 = arith.constant 0 : index
      %c0_53 = arith.constant 0 : index
      %52 = vector.load %arg8[%c3_51, %c0_52, %c0_53] : memref<4x16x8xf32, #tpu.memory_space<vmem>>, vector<1x16x8xf32>
      %53 = vector.shape_cast %52 : vector<1x16x8xf32> to vector<16x8xf32>
      %cst_54 = arith.constant dense<0.000000e+00> : vector<8x8xf32>
      %54 = tpu.matmul %22, %53, %cst_54 {dimension_numbers = #tpu.dot_dimension_numbers<[1], [0], [0], [1], [0, 0, 1, 1], [], []>} : vector<8x16xf32>, vector<16x8xf32>, vector<8x8xf32> -> vector<8x8xf32>
      %55 = arith.addf %51, %54 : vector<8x8xf32>
      %c3_55 = arith.constant 3 : index
      %c0_56 = arith.constant 0 : index
      %c0_57 = arith.constant 0 : index
      %56 = vector.load %arg9[%c3_55, %c0_56, %c0_57] : memref<4x8x8xf32, #tpu.memory_space<vmem>>, vector<1x8x8xf32>
      %57 = vector.shape_cast %56 : vector<1x8x8xf32> to vector<8x8xf32>
      %58 = vector.shape_cast %55 : vector<8x8xf32> to vector<1x8x8xf32>
      tpu.vector_store %arg9[%c3_55, %c0_56, %c0_57], %58 {strides = array<i32>} : memref<4x8x8xf32, #tpu.memory_space<vmem>>, vector<1x8x8xf32>,
      %c0_i32_58 = arith.constant 0 : i32
      %59 = arith.cmpi eq, %arg1, %c0_i32_58 : i32
      %60 = arith.extui %59 : i1 to i32
      %c0_i32_59 = arith.constant 0 : i32
      %61 = arith.cmpi ne, %60, %c0_i32_59 : i32
      scf.if %61 {
        %c0_60 = arith.constant 0 : index
        %c0_61 = arith.constant 0 : index
        %c0_62 = arith.constant 0 : index
        %62 = vector.load %arg9[%c0_60, %c0_61, %c0_62] : memref<4x8x8xf32, #tpu.memory_space<vmem>>, vector<4x8x8xf32>
        %c0_63 = arith.constant 0 : index
        %c0_64 = arith.constant 0 : index
        %c0_65 = arith.constant 0 : index
        %c0_66 = arith.constant 0 : index
        %63 = vector.load %arg7[%c0_63, %c0_64, %c0_65, %c0_66] : memref<1x4x8x8xf32, #tpu.memory_space<vmem>>, vector<1x4x8x8xf32>
        %64 = vector.shape_cast %63 : vector<1x4x8x8xf32> to vector<4x8x8xf32>
        %65 = vector.shape_cast %62 : vector<4x8x8xf32> to vector<1x4x8x8xf32>
        tpu.vector_store %arg7[%c0_63, %c0_64, %c0_65, %c0_66], %65 {strides = array<i32>} : memref<1x4x8x8xf32, #tpu.memory_space<vmem>>, vector<1x4x8x8xf32>,
      } else {
      }
    } else {
    }
    return
  }
  func.func @transform_0(%arg0: i32, %arg1: i32, %arg2: i32, %arg3: memref<2xi32, #tpu.memory_space<smem>>) -> (i32, i32, i32, i32) {
    %c0 = arith.constant 0 : index
    %0 = memref.load %arg3[%c0] : memref<2xi32, #tpu.memory_space<smem>>
    %1 = arith.addi %0, %arg1 : i32
    %c1 = arith.constant 1 : index
    %2 = memref.load %arg3[%c1] : memref<2xi32, #tpu.memory_space<smem>>
    %3 = arith.addi %2, %arg2 : i32
    %c0_i32 = arith.constant 0 : i32
    %c0_i32_0 = arith.constant 0 : i32
    return %arg0, %c0_i32, %1, %3 : i32, i32, i32, i32
  }
  func.func @transform_1(%arg0: i32, %arg1: i32, %arg2: i32, %arg3: memref<2xi32, #tpu.memory_space<smem>>) -> (i32, i32, i32) {
    %c0_i32 = arith.constant 0 : i32
    %c0_i32_0 = arith.constant 0 : i32
    %c0_i32_1 = arith.constant 0 : i32
    return %arg1, %c0_i32, %c0_i32_0 : i32, i32, i32
  }
  func.func @transform_2(%arg0: i32, %arg1: i32, %arg2: i32, %arg3: memref<2xi32, #tpu.memory_space<smem>>) -> (i32, i32, i32) {
    %c0_i32 = arith.constant 0 : i32
    %c0_i32_0 = arith.constant 0 : i32
    %c0_i32_1 = arith.constant 0 : i32
    return %arg2, %c0_i32, %c0_i32_0 : i32, i32, i32
  }
  func.func @transform_3(%arg0: i32, %arg1: i32, %arg2: i32, %arg3: memref<2xi32, #tpu.memory_space<smem>>) -> (i32, i32, i32, i32) {
    %c0_i32 = arith.constant 0 : i32
    %c0_i32_0 = arith.constant 0 : i32
    %c0_i32_1 = arith.constant 0 : i32
    %c0_i32_2 = arith.constant 0 : i32
    return %arg0, %c0_i32, %c0_i32_0, %c0_i32_1 : i32, i32, i32, i32
  }
}

</mosaic_0001>

<bundles_post_ra>
// kernel: tpu_custom_call.1
= control target key start
LH: loop header
LB: loop body
LE: loop exit
PB: predicated region body
PF: predicated region fallthrough
CT: control target
= control target key end

     0   :  { %s1608_s0 = inlined_call_operand.vmem [shape: s32[2], index: 0, kind: input, shape index: {}]   ;;  %s1609_s1 = inlined_call_operand.hbm [shape: f32[2,4,16,16], index: 1, kind: input, shape index: {}]   ;;  %s1610_s2 = inlined_call_operand.vmem [shape: f32[1,8,16], index: 2, kind: input, shape index: {}]   ;;  %s1611_s3 = inlined_call_operand.vmem [shape: f32[1,16,8], index: 3, kind: input, shape index: {}]   ;;  %s1612_s4 = inlined_call_operand.hbm [shape: f32[2,4,8,8], index: 4, kind: output, shape index: {}]  }
   0x1   :  { %s9_s17 = sshll.u32 %s1608_s0, 4  ;;  %s10_s17 = int_to_ptr.vmem [resolvable:$true] %s9_s17 }
   0x2   :  { %s1132_s18 = scalar_lea.vmem %s10_s17, 16  ;;  %p1137_p1 = scmp.lt.s32.totalorder %s10_s17, %s10_s17 }
   0x3   :  { %p1133_p0 = scmp.ne.s32.totalorder %s10_s17, %s1132_s18  ;;  %p1138_p2 = scmp.lt.s32.totalorder %s1132_s18, %s1132_s18 }
   0x5   :  { %p1139_p3 = por %p1138_p2, %p1137_p1 }
   0x7   :  { %p1140_p4 = pnand %p1139_p3, %p1133_p0 }
   0x9   :  { %1143 = shalt.err (!%p1140_p4)  }
   0xa   :  { %s1284_s19 = smov [#allocation5]  }
   0xb   :  { %12 = dma.vmem_to_smem %s10_s17, 16, %s1284_s19, [#allocation4] }
   0xc   :  { %1238 = dma.done.wait [#allocation4], 16 }
   0xd   :  { %1239 = vsyncadd [#allocation4], 4294967280 }
   0xe   :  { %14 = sfence }
   0xf   :  { %15 = vsyncpa [#allocation7], 0 }
  0x10   :  { %17 = vsyncpa [#allocation7 + $0x1], 0 }
  0x11   :  { %18 = vsyncpa [#allocation8], 0 }
  0x12   :  { %20 = vsyncpa [#allocation8 + $0x1], 0  ;;  %s1322_s20 = smov 0   ;;  %s1324_s0 = smov 0  }
  0x13   :  { %s1326_s21 = smov 0   ;;  %s1328_s22 = smov 0  }
  0x14   :  { %s1330_s23 = smov 0   ;;  %s1332_s24 = smov 0  }
  0x15   :  { %s1334_s25 = smov 0   ;;  %s1336_s26 = smov 0  }
  0x16   :  { %s1338_s27 = smov 0  }
  0x17 LB: > { %s922_s28 = sadd.s32 4294967295, %s1282_s27   ;;  %s923_s29 = sadd.s32 4294967294, %s1282_s27   ;;  %s1282_s27 = sphi %s1338_s27, %s26_s27   ;;  %s1278_s26 = sphi %s1336_s26, %s1635_s26   ;;  %s1274_s25 = sphi %s1334_s25, %s1634_s25   ;;  %s1270_s24 = sphi %s1332_s24, %s1633_s24   ;;  %s1266_s23 = sphi %s1330_s23, %s1632_s23   ;;  %s1262_s22 = sphi %s1328_s22, %s1631_s22   ;;  %s1258_s21 = sphi %s1326_s21, %s1630_s21   ;;  %s1254_s0 = sphi %s1324_s0, %s1629_s0   ;;  %s1250_s20 = sphi %s1322_s20, %s1628_s20  }
  0x18   : > { %s45_s30 = sadd.s32 1, %s1278_s26  ;;  %s49_s5 = sld [smem:[#allocation5]] }
  0x19   : > { %p47_p5 = scmp.ge.s32.totalorder %s45_s30, 2  ;;  %s924_s6 = sld [smem:[#allocation5 + $0x1]] }
  0x1a   : > { %s64_s7 = sadd.s32 1, %s1270_s24  ;;  %p71_p6 = scmp.ne.s32.totalorder %s1270_s24, %s1266_s23 }
  0x1b   : > { %s1637_s30 = smov (%p47_p5, %s45_s30), 0  ;;  %p72_p7 = scmp.eq.s32.totalorder %s1282_s27, 0 }
  0x1c   : > { %1615 = sst [smem:[#allocation13_spill]] %s1637_s30  ;;  %p77_p8 = scmp.ne.s32.totalorder %s1266_s23, %s1262_s22 }
  0x1d   : > { %s57_s8 = ssub.s32 %s1278_s26, %s1637_s30  ;;  %p78_p9 = scmp.eq.s32.totalorder %s922_s28, 0 }
  0x1e   : > { %p1377_p10 = por %p72_p7, %p71_p6  ;;  %p62_p12 = scmp.eq.s32.totalorder %s57_s8, 0 }
  0x1f   : > { %p1381_p11 = por %p78_p9, %p77_p8  ;;  %s142_s11 = sadd.s32 1, %s1258_s21 }
  0x20   : > { %p152_p13 = scmp.ne.s32.totalorder %s1258_s21, %s1254_s0  ;;  %p153_p0 = scmp.eq.s32.totalorder %s922_s28, 1 }
  0x21   : > { %s1389_s12 = scalar_select %p62_p12, %s1270_s24, %s64_s7  }
  0x22   : > { %s1392_s13 = scalar_select %p62_p12, %s1258_s21, %s142_s11  }
  0x23   : > { %1618 = sst [smem:[#allocation14_spill]] %s1389_s12  ;;  %p158_p1 = scmp.ne.s32.totalorder %s1254_s0, %s1250_s20 }
  0x24   : > { %p159_p2 = scmp.eq.s32.totalorder %s923_s29, 1  ;;  %p1397_p4 = por %p153_p0, %p152_p13 }
  0x25   : > { %p1050_p5 = scmp.lt.s32.totalorder %s1282_s27, 2  ;;  %s194_s16 = sand.u32 1, %s1270_s24  }
  0x26   : > { %s1619_s14 = scalar_select %p1397_p4, 1, 0 }
  0x27   : > { %p1402_p6 = por %p159_p2, %p158_p1  ;;  %s930_s17 = sshll.u32 %s194_s16, 6 }
  0x28   : > { %s932_s18 = sshll.u32 %s49_s5, 1  ;;  %s933_s22 = sshll.u32 %s1278_s26, 3 }
  0x29   : > { %s1620_s15 = scalar_select %p1402_p6, 1, 0 }
  0x2a   : > { %s207_s19 = sadd.s32 %s932_s18, %s924_s6  ;;  %s198_s29 = scalar_lea.vmem [#allocation6], %s930_s17 }
  0x2b   : > { %s209_s28 = sadd.s32 %s933_s22, %s207_s19  ;;  %s212_s7 = sshll.u32 %s198_s29, 4  ;;  %s1408_s7 = int_to_ptr.vmem [resolvable:$true] %s212_s7 }
  0x2c   : > { %s934_s8 = sshll.u32 %s209_s28, 7  ;;  %p1419_p7 = pnand %p1050_p5, %p1377_p10 }
  0x2d   : > { %s1413_s12 = scalar_lea.hbm %s1609_s1, %s934_s8  ;;  %s1424_s6 = scalar_lea.sflag [#allocation7], %s194_s16 }
  0x2e   : > { %s1144_s17 = scalar_lea.hbm %s1413_s12, 1024  ;;  %p1146_p12 = pneg %p1419_p7 }
  0x2f   : > { %p1145_p9 = scmp.ne.s32.totalorder %s1413_s12, %s1144_s17  ;;  %s1149_s18 = scalar_lea.hbm %s1609_s1, 2048 }
  0x30   : > { %p1150_p10 = scmp.lt.u32.totalorder %s1413_s12, %s1609_s1  ;;  %p1151_p1 = scmp.lt.u32.totalorder %s1149_s18, %s1144_s17 }
  0x31   : > { %p1147_p13 = pnand %p1146_p12, %p1145_p9  ;;  %p1153_p5 = scmp.lt.u32.totalorder %s1144_s17, %s1413_s12 }
  0x32   : > { %p1152_p2 = por %p1151_p1, %p1150_p10 }
  0x33   : > { %p1148_p0 = pneg %p1147_p13 }
  0x34   : > { %p1154_p3 = por %p1153_p5, %p1152_p2 }
  0x36   : > { %p1155_p8 = pnand %p1154_p3, %p1148_p0 }
  0x38   : > { %1158 = shalt.err (!%p1155_p8)
}
  0x39   : > { %s1159_s16 = scalar_lea.vmem %s1408_s7, 1024  ;;  %s1285_s28 = smov [#allocation6]  }
  0x3a   : > { %p1160_p9 = scmp.ne.s32.totalorder %s1408_s7, %s1159_s16  ;;  %s1164_s29 = sshll.u32 %s1285_s28, 4  ;;  %s1165_s29 = int_to_ptr.vmem [resolvable:$false] %s1164_s29 }
  0x3b   : > { %s1166_s8 = scalar_lea.vmem %s1165_s29, 2048  ;;  %p1167_p4 = scmp.lt.s32.totalorder %s1408_s7, %s1165_s29 }
  0x3c   : > { %p1162_p13 = pnand %p1160_p9, %p1146_p12  ;;  %p1168_p10 = scmp.lt.s32.totalorder %s1166_s8, %s1159_s16 }
  0x3e   : > { %p1163_p6 = pneg %p1162_p13  ;;  %p1169_p1 = por %p1168_p10, %p1167_p4 }
  0x40   : > { %p1170_p2 = pnand %p1169_p1, %p1163_p6 }
  0x42   : > { %1173 = shalt.err (!%p1170_p2)
}
  0x43   : > { %s1286_s11 = smov 128   ;;  %s1287_s17 = smov 8  }
  0x44   : > { %1045 = dma.hbm_to_vmem [thread:$0]  (!%p1419_p7), %s1413_s12, 1024, %s1408_s7, %s1424_s6, %s1286_s11, %s1286_s11, %s1287_s17  }
  0x45   : > { %p220_p3 = scmp.lt.s32.totalorder %s1282_s27, 3  ;;  %p1622_p8 = scmp.ge.s32.totalorder %s1282_s27, 1 }
  0x47   : > { %p221_p12 = pnand %p1622_p8, %p220_p3 }
  0x48   : > { %s226_s30 = sand.u32 (!%p221_p12), 1, %s1266_s23  }
  0x49   : > { %224 = sbr.rel (%p221_p12) target bundleno = 565 (0x235), region = 32  ;;  %s936_s9 = sshll.u32 (!%p221_p12), %s226_s30, 6 }
  0x4a   : > { %s227_s18 = scalar_lea.sflag (!%p221_p12), [#allocation7], %s226_s30  ;;  %s1456_s19 = scalar_lea.vmem (!%p221_p12), [#allocation6], %s936_s9 }
  0x50   : > { %1241 = dma.done.wait (%p1381_p11), %s227_s18, 1024  }
  0x51   : > { %1243 = vsyncadd (%p1381_p11), %s227_s18, 4294966272  ;;  %vm280_vm0 = vcmask 64512   ;;  %v1288_v0 = vmov 0.0   ;;  %vm309_vm1 = vcmask 130048   ;;  %v307_v1 = vld [vmem:[%s1611_s3] sm:$0xff]  ;;  %v308_v2 = vld [vmem:[%s1611_s3 + $0x8] sm:$0xff] }
  0x52   : > { %282 = vst.msk [vmem:[#allocation2 + $0x8] sm:$0xff] %vm280_vm0, %v1288_v0  ;;  %281 = vst.msk [vmem:[#allocation2] sm:$0xff] %vm280_vm0, %v1288_v0  ;;  %v299_v3 = vld [vmem:[%s1456_s19] sm:$0xff]  ;;  %v1022_v4 = vpack.c.bf16 %v308_v2, %v307_v1  ;;  %v300_v5 = vld [vmem:[%s1456_s19 + $0x8] sm:$0xff]  ;;  %v1289_v12 = vmov 0.0|0.0   ;;  %vm1290_vm2 = vmmov 0  }
  0x53   : > { %283 = vst.msk [vmem:[#allocation2 + $0x10] sm:$0xff] %vm280_vm0, %v1288_v0  ;;  %284 = vst.msk [vmem:[#allocation2 + $0x18] sm:$0xff] %vm280_vm0, %v1288_v0  ;;  %982 = vmatprep.mubr.msk.f32.mxu0 %vm309_vm1, %v299_v3  ;;  %v301_v6 = vld [vmem:[%s1456_s19 + $0x10] sm:$0xff]  ;;  %v302_v7 = vld [vmem:[%s1456_s19 + $0x18] sm:$0xff]  ;;  %1026 = vmatprep.subr.bf16.mxu1 %v1289_v12  ;;  %s259_s16 = sand.u32 1, %s1254_s0   ;;  %s955_s8 = sshll.u32 %s1274_s25, 9 }
  0x54   : > { %285 = vst.msk [vmem:[#allocation2 + $0x20] sm:$0xff] %vm280_vm0, %v1288_v0  ;;  %286 = vst.msk [vmem:[#allocation2 + $0x28] sm:$0xff] %vm280_vm0, %v1288_v0  ;;  %1023 = vmatprep.subr.bf16.mxu0 %v1022_v4  ;;  %v303_v8 = vld [vmem:[%s1456_s19 + $0x20] sm:$0xff]  ;;  %v304_v9 = vld [vmem:[%s1456_s19 + $0x28] sm:$0xff]  ;;  %998 = vmatprep.mubr.msk.f32.mxu1 %vm1290_vm2, %v1288_v0  ;;  %s937_s28 = sshll.u32 %s259_s16, 5  ;;  %s1545_s9 = scalar_lea.hbm %s1612_s4, %s955_s8 }
  0x55   : > { %287 = vst.msk [vmem:[#allocation2 + $0x30] sm:$0xff] %vm280_vm0, %v1288_v0  ;;  %288 = vst.msk [vmem:[#allocation2 + $0x38] sm:$0xff] %vm280_vm0, %v1288_v0  ;;  %1025 = vmatpush3.bf16.msra.mxu0 %v1022_v4  ;;  %v305_v10 = vld [vmem:[%s1456_s19 + $0x30] sm:$0xff]  ;;  %v306_v11 = vld [vmem:[%s1456_s19 + $0x38] sm:$0xff]  ;;  %s261_s29 = scalar_lea.vmem [#allocation9], %s937_s28  ;;  %s1552_s18 = scalar_lea.sflag [#allocation8], %s259_s16 }
  0x56   : > { %295 = vst.msk [vmem:[#allocation3] sm:$0xff] %vm280_vm0, %v1288_v0  ;;  %296 = vst.msk [vmem:[#allocation3 + $0x8] sm:$0xff] %vm280_vm0, %v1288_v0  ;;  %v467_v40 = vld [vmem:[%s1610_s2] sm:$0xff]  ;;  %s802_s11 = sshll.u32 %s261_s29, 4  ;;  %p1623_p4 = scmp.ne.s32.totalorder %s1619_s14, 0  ;;  %s1547_s11 = int_to_ptr.vmem [resolvable:$true] %s802_s11 }
  0x57   : > { %297 = vst.msk [vmem:[#allocation3 + $0x10] sm:$0xff] %vm280_vm0, %v1288_v0  ;;  %298 = vst.msk [vmem:[#allocation3 + $0x18] sm:$0xff] %vm280_vm0, %v1288_v0  ;;  %s1174_s25 = scalar_lea.vmem %s1547_s11, 512  ;;  %s1291_s19 = smov [#allocation9]  }
  0x58   : > { %983 = vmatmul.mubr.msk.f32.vlgmr.msra.gmra.mrb[0].mxu0 %vm309_vm1, %v300_v5  ;;  %p1175_p11 = scmp.ne.s32.totalorder %s1547_s11, %s1174_s25  ;;  %s1178_s10 = sshll.u32 %s1291_s19, 4  ;;  %s1179_s10 = int_to_ptr.vmem [resolvable:$false] %s1178_s10 }
  0x59   : > { %985 = vmatprep.mubr.msk.f32.mxu0 %vm309_vm1, %v301_v6  ;;  %v440_v13 = vld [vmem:[#allocation2 + $0x8] sm:$0xff]  ;;  %v439_v14 = vld [vmem:[#allocation2] sm:$0xff]  ;;  %s1180_s12 = scalar_lea.vmem %s1179_s10, 1024  ;;  %p1181_p0 = scmp.lt.s32.totalorder %s1547_s11, %s1179_s10 }
  0x5a   : > { %v442_v19 = vld [vmem:[#allocation2 + $0x18] sm:$0xff]  ;;  %v441_v20 = vld [vmem:[#allocation2 + $0x10] sm:$0xff]  ;;  %p1176_p6 = pnand %p1175_p11, %p1623_p4  ;;  %p1182_p5 = scmp.lt.s32.totalorder %s1180_s12, %s1174_s25 }
  0x5b   : > { %v444_v25 = vld [vmem:[#allocation2 + $0x28] sm:$0xff]  ;;  %v443_v26 = vld [vmem:[#allocation2 + $0x20] sm:$0xff] }
  0x5c   : > { %986 = vmatmul.mubr.msk.f32.gmra.mrb[2].mxu0 %vm309_vm1, %v302_v7  ;;  %v446_v31 = vld [vmem:[#allocation2 + $0x38] sm:$0xff]  ;;  %v445_v33 = vld [vmem:[#allocation2 + $0x30] sm:$0xff]  ;;  %p1177_p7 = pneg %p1176_p6  ;;  %p1183_p9 = por %p1182_p5, %p1181_p0 }
  0x5d   : > { %988 = vmatprep.mubr.msk.f32.mxu0 %vm309_vm1, %v303_v8  ;;  %v468_v50 = vld [vmem:[#allocation3] sm:$0xff]  ;;  %v547_v54 = vld [vmem:[#allocation3 + $0x8] sm:$0xff] }
  0x5e   : > { %v624_v58 = vld [vmem:[#allocation3 + $0x10] sm:$0xff]  ;;  %v701_v62 = vld [vmem:[#allocation3 + $0x18] sm:$0xff]  ;;  %p1184_p13 = pnand %p1183_p9, %p1177_p7 }
  0x60   : > { %989 = vmatmul.mubr.msk.f32.gmra.mrb[4].mxu0 %vm309_vm1, %v304_v9 }
  0x61   : > { %991 = vmatprep.mubr.msk.f32.mxu0 %vm309_vm1, %v305_v10 }
  0x64   : > { %992 = vmatmul.mubr.msk.f32.gmra.mrb[6].mxu0 %vm309_vm1, %v306_v11 }
 0x12b   : > { %v984_v15 = vpop.f32.mrb[0].mxu0 }
 0x12c   : > { %v448_v16 = vadd.f32 %v984_v15, %v440_v13  ;;  %v400_v17 = vpop.f32.mrb[1].mxu0 }
 0x12d   : > { %v447_v18 = vadd.f32 %v439_v14, %v400_v17 }
 0x12e   : > { %457 = vst.msk [vmem:[#allocation2 + $0x8] sm:$0xff] %vm280_vm0, %v448_v16 }
 0x12f   : > { %456 = vst.msk [vmem:[#allocation2] sm:$0xff] %vm280_vm0, %v447_v18  ;;  %v987_v21 = vpop.f32.mrb[2].mxu0 }
 0x130   : > { %v450_v22 = vadd.f32 %v987_v21, %v442_v19  ;;  %v410_v23 = vpop.f32.mrb[3].mxu0 }
 0x131   : > { %v449_v24 = vadd.f32 %v441_v20, %v410_v23 }
 0x132   : > { %459 = vst.msk [vmem:[#allocation2 + $0x18] sm:$0xff] %vm280_vm0, %v450_v22 }
 0x133   : > { %458 = vst.msk [vmem:[#allocation2 + $0x10] sm:$0xff] %vm280_vm0, %v449_v24  ;;  %v990_v27 = vpop.f32.mrb[4].mxu0 }
 0x134   : > { %v452_v28 = vadd.f32 %v990_v27, %v444_v25  ;;  %v420_v29 = vpop.f32.mrb[5].mxu0 }
 0x135   : > { %v451_v30 = vadd.f32 %v443_v26, %v420_v29  ;;  %v470_v32 = vld [vmem:[#allocation2 + $0x8] sm:$0xff] }
 0x136   : > { %461 = vst.msk [vmem:[#allocation2 + $0x28] sm:$0xff] %vm280_vm0, %v452_v28  ;;  %v469_v34 = vld [vmem:[#allocation2] sm:$0xff] }
 0x137   : > { %460 = vst.msk [vmem:[#allocation2 + $0x20] sm:$0xff] %vm280_vm0, %v451_v30  ;;  %v993_v35 = vpop.f32.mrb[6].mxu0  ;;  %v1027_v36 = vpack.c.bf16 %v470_v32, %v469_v34 }
 0x138   : > { %v454_v37 = vadd.f32 %v993_v35, %v446_v31  ;;  %v430_v38 = vpop.f32.mrb[7].mxu0 }
 0x139   : > { %v453_v39 = vadd.f32 %v445_v33, %v430_v38  ;;  %1028 = vmatpush3.bf16.msra.mxu1 %v1027_v36  ;;  %v550_v41 = vld [vmem:[#allocation2 + $0x18] sm:$0xff] }
 0x13a   : > { %463 = vst.msk [vmem:[#allocation2 + $0x38] sm:$0xff] %vm280_vm0, %v454_v37  ;;  %1029 = vmatprep.subr.bf16.mxu1 %v1289_v12  ;;  %v549_v42 = vld [vmem:[#allocation2 + $0x10] sm:$0xff] }
 0x13b   : > { %462 = vst.msk [vmem:[#allocation2 + $0x30] sm:$0xff] %vm280_vm0, %v453_v39  ;;  %v1030_v43 = vpack.c.bf16 %v550_v41, %v549_v42 }
 0x13c   : > { %999 = vmatmul.mubr.msk.f32.vlgmr.msra.gmra.mrb[0].mxu1 %vm309_vm1, %v467_v40 }
 0x13d   : > { %1031 = vmatpush3.bf16.msra.mxu1 %v1030_v43  ;;  %1005 = vmatprep.mubr.msk.f32.mxu1 %vm1290_vm2, %v1288_v0  ;;  %v627_v44 = vld [vmem:[#allocation2 + $0x28] sm:$0xff] }
 0x13e   : > { %1032 = vmatprep.subr.bf16.mxu1 %v1289_v12  ;;  %v626_v45 = vld [vmem:[#allocation2 + $0x20] sm:$0xff] }
 0x13f   : > { %v1033_v46 = vpack.c.bf16 %v627_v44, %v626_v45 }
 0x140   : > { %1006 = vmatmul.mubr.msk.f32.vlgmr.msra.gmra.mrb[2].mxu1 %vm309_vm1, %v467_v40 }
 0x141   : > { %1034 = vmatpush3.bf16.msra.mxu1 %v1033_v46  ;;  %1012 = vmatprep.mubr.msk.f32.mxu1 %vm1290_vm2, %v1288_v0  ;;  %v704_v47 = vld [vmem:[#allocation2 + $0x38] sm:$0xff] }
 0x142   : > { %1035 = vmatprep.subr.bf16.mxu1 %v1289_v12  ;;  %v703_v48 = vld [vmem:[#allocation2 + $0x30] sm:$0xff] }
 0x143   : > { %v1036_v49 = vpack.c.bf16 %v704_v47, %v703_v48 }
 0x144   : > { %1013 = vmatmul.mubr.msk.f32.vlgmr.msra.gmra.mrb[4].mxu1 %vm309_vm1, %v467_v40 }
 0x145   : > { %1037 = vmatpush3.bf16.msra.mxu1 %v1036_v49  ;;  %1019 = vmatprep.mubr.msk.f32.mxu1 %vm1290_vm2, %v1288_v0 }
 0x148   : > { %1020 = vmatmul.mubr.msk.f32.vlgmr.msra.gmra.mrb[6].mxu1 %vm309_vm1, %v467_v40 }
 0x20f   : > { %v540_v51 = vpop.f32.mrb[0].mxu1 }
 0x210   : > { %v544_v52 = vadd.f32 %v540_v51, %v468_v50  ;;  %v1000_v53 = vpop.f32.mrb[1].mxu1 }
 0x212   : > { %545 = vst.msk [vmem:[#allocation3] sm:$0xff] %vm280_vm0, %v544_v52 }
 0x213   : > { %v617_v55 = vpop.f32.mrb[2].mxu1 }
 0x214   : > { %v621_v56 = vadd.f32 %v617_v55, %v547_v54  ;;  %v1007_v57 = vpop.f32.mrb[3].mxu1 }
 0x216   : > { %622 = vst.msk [vmem:[#allocation3 + $0x8] sm:$0xff] %vm280_vm0, %v621_v56 }
 0x217   : > { %v694_v59 = vpop.f32.mrb[4].mxu1 }
 0x218   : > { %v698_v60 = vadd.f32 %v694_v59, %v624_v58  ;;  %v1014_v61 = vpop.f32.mrb[5].mxu1 }
 0x219   : > { %v780_v63 = vld [vmem:[#allocation3] sm:$0xff] }
 0x21a   : > { %699 = vst.msk [vmem:[#allocation3 + $0x10] sm:$0xff] %vm280_vm0, %v698_v60  ;;  %784 = vst.msk [vmem:[%s261_s29] sm:$0xff] %vm280_vm0, %v780_v63 }
 0x21b   : > { %v771_v0 = vpop.f32.mrb[6].mxu1 }
 0x21c   : > { %v775_v1 = vadd.f32 %v771_v0, %v701_v62  ;;  %v1021_v2 = vpop.f32.mrb[7].mxu1 }
 0x21d   : > { %v781_v3 = vld [vmem:[#allocation3 + $0x8] sm:$0xff] }
 0x21e   : > { %776 = vst.msk [vmem:[#allocation3 + $0x18] sm:$0xff] %vm280_vm0, %v775_v1  ;;  %785 = vst.msk [vmem:[%s261_s29 + $0x8] sm:$0xff] %vm280_vm0, %v781_v3 }
 0x221   : > { %v782_v4 = vld [vmem:[#allocation3 + $0x10] sm:$0xff] }
 0x222   : > { %786 = vst.msk [vmem:[%s261_s29 + $0x10] sm:$0xff] %vm280_vm0, %v782_v4 }
 0x225   : > { %v783_v5 = vld [vmem:[#allocation3 + $0x18] sm:$0xff] }
 0x226   : > { %787 = vst.msk [vmem:[%s261_s29 + $0x18] sm:$0xff] %vm280_vm0, %v783_v5 }
 0x227   : > { %1187 = shalt.err (!%p1184_p13)
}
 0x228   : > { %s1188_s7 = scalar_lea.hbm %s1545_s9, 512  ;;  %s1192_s22 = scalar_lea.hbm %s1612_s4, 1024 }
 0x229   : > { %p1189_p10 = scmp.ne.s32.totalorder %s1545_s9, %s1188_s7  ;;  %p1193_p3 = scmp.lt.u32.totalorder %s1545_s9, %s1612_s4 }
 0x22a   : > { %p1194_p8 = scmp.lt.u32.totalorder %s1192_s22, %s1188_s7  ;;  %p1196_p11 = scmp.lt.u32.totalorder %s1188_s7, %s1545_s9 }
 0x22b   : > { %p1190_p1 = pnand %p1189_p10, %p1623_p4 }
 0x22c   : > { %p1195_p12 = por %p1194_p8, %p1193_p3 }
 0x22d   : > { %p1191_p2 = pneg %p1190_p1 }
 0x22e   : > { %p1197_p6 = por %p1196_p11, %p1195_p12 }
 0x230   : > { %p1198_p7 = pnand %p1197_p6, %p1191_p2 }
 0x232   : > { %1201 = shalt.err (!%p1198_p7)
}
 0x233   : > { %s1292_s29 = smov 128   ;;  %s1293_s8 = smov 8  }
 0x234   : > { %1040 = dma.vmem_to_hbm [thread:$0]  (%p1623_p4), %s1547_s11, 512, %s1545_s9, %s1552_s18, %s1292_s29, %s1292_s29, %s1293_s8  }
 0x235 PF: > { %s817_s17 = sand.u32 1, %s1250_s20   ;;  %p1624_p0 = scmp.ne.s32.totalorder %s1620_s15, 0 }
 0x236   : > { %p1625_p5 = scmp.ge.s32.totalorder %s1282_s27, 2  ;;  %s818_s30 = scalar_lea.sflag [#allocation8], %s817_s17 }
 0x238   : > { %p1047_p9 = pnand %p1625_p5, %p1624_p0 }
 0x23a   : > { %1245 = dma.done.wait (!%p1047_p9), %s818_s30, 512  }
 0x23b   : > { %1247 = vsyncadd (!%p1047_p9), %s818_s30, 4294966784  ;;  %s26_s27 = sadd.s32 1, %s1282_s27   ;;  %s1626_s14 = sld [smem:[#allocation14_spill]] }
 0x23c   : > { %p23_p13 = scmp.ge.s32.totalorder %s26_s27, 4   ;;  %s1627_s11 = sld [smem:[#allocation13_spill]] }
 0x23d   : > { %s1628_s20 = smov %s1254_s0  ;;  %s1629_s0 = smov %s1258_s21 }
 0x23e   : > { %s1630_s21 = smov %s1392_s13  ;;  %s1631_s22 = smov %s1266_s23 }
 0x23f   : > { %s1632_s23 = smov %s1270_s24  ;;  %s1634_s25 = smov %s1278_s26 }
 0x240   :  { %25 = sbr.rel (!%p23_p13) target bundleno = 23 (0x17), region = 105 }
 0x241   : > { %s1633_s24 = smov %s1626_s14 }
 0x242   : > { %s1635_s26 = smov %s1627_s11 }
 0x247   :  { %823 = vsyncpa [#allocation7], 1 }
 0x248   :  { %825 = vsyncpa [#allocation7 + $0x1], 1 }
 0x249   :  { %826 = vsyncpa [#allocation8], 1 }
 0x24a   :  { %828 = vsyncpa [#allocation8 + $0x1], 1 }

</bundles_post_ra>
